<compile_context>
chip_gen: v5e
topology: v5e:2x2
jax: 0.10.0
libtpu: 0.0.40
codegen_flags: <defaults>
</compile_context>

<pallas_src>
import math

import jax
import jax.numpy as jnp
from jax import lax
from jax.experimental import pallas as pl
from jax.experimental.pallas import tpu as pltpu


# ---------------------------------------------------------------------------
# Pass 1: per-block x-Gram (X X^T over pixels) + per-channel sums of x.
#         BN statistics of z = W x are finalised from these outside the kernel.
# ---------------------------------------------------------------------------
def _make_stats_kernel(B, C):
    def stats_kernel(x_ref, o_ref):
        # x_ref: (B, C, HW)   o_ref: (1, C, C+1) f32  [Gram | channel sum]
        g = jnp.zeros((C, C), jnp.float32)
        s = jnp.zeros((C, 1), jnp.float32)
        for b in range(B):
            xb = x_ref[b]                                          # (C, HW)
            g = g + lax.dot_general(                               # X X^T (MXU)
                xb, xb, (((1,), (1,)), ((), ())),
                preferred_element_type=jnp.float32)
            s = s + jnp.sum(xb.astype(jnp.float32), axis=1, keepdims=True)
        o_ref[0] = jnp.concatenate([g, s], axis=1)                 # (C, C+1)

    return stats_kernel


# ---------------------------------------------------------------------------
# Pass 2: fused 1x1-conv + BN(scale/shift precomputed) + ReLU + spatial pyramid
#         max pooling (levels 4 -> 2 -> 1) + Linear(21*C, 64) + ReLU.
# ---------------------------------------------------------------------------
def _make_fused_kernel(B, C, H, W):
    Hb, Wb = H // 4, W // 4

    def fused_kernel(x_ref, w_ref, ss_ref, fcw_ref, fcb_ref, o_ref):
        # x_ref:  (B, C, HW)         w_ref:   (C, C)
        # ss_ref: (C, 2)  [scale, shift]      fcw_ref: (64, 21*C)
        # fcb_ref:(64, 1)            o_ref:   (1, 64, B)
        wmat = w_ref[...]
        scale = ss_ref[:, 0:1]                                     # (C, 1)
        shift = ss_ref[:, 1:2]                                     # (C, 1)

        cols = []
        for b in range(B):
            xb = x_ref[b]                                          # (C, HW)
            # 1x1 conv as a channel matmul on the lane-dense layout.
            z = jnp.dot(wmat, xb, preferred_element_type=jnp.float32)
            # BN (hoisted batch statistics) + ReLU.
            y = jnp.maximum(z * scale + shift, 0.0)                # (C, HW)

            # Hierarchical pyramid max pooling: 4x4 bins -> 2x2 -> global.
            p4 = []
            for bi in range(4):
                r0 = bi * Hb
                band = y[:, r0 * W:(r0 + 1) * W]                   # (C, W)
                for r in range(1, Hb):
                    band = jnp.maximum(band,
                                       y[:, (r0 + r) * W:(r0 + r + 1) * W])
                row = []
                for bj in range(4):
                    row.append(jnp.max(band[:, bj * Wb:(bj + 1) * Wb],
                                       axis=1, keepdims=True))     # (C, 1)
                p4.append(row)

            p2 = []
            for i in range(2):
                for j in range(2):
                    p2.append(jnp.maximum(
                        jnp.maximum(p4[2 * i][2 * j], p4[2 * i][2 * j + 1]),
                        jnp.maximum(p4[2 * i + 1][2 * j],
                                    p4[2 * i + 1][2 * j + 1])))
            p1 = jnp.maximum(jnp.maximum(p2[0], p2[1]),
                             jnp.maximum(p2[2], p2[3]))

            # Register-resident feature column, row index = bin*C + channel.
            feats = [p1] + p2 + [p4[i][j] for i in range(4) for j in range(4)]
            cols.append(jnp.concatenate(feats, axis=0))            # (21*C, 1)

        feat_mat = jnp.concatenate(cols, axis=1)                   # (21*C, B)
        # Single FC matmul for the whole block (weight pre-permuted + pre-T).
        out_t = jnp.dot(fcw_ref[...], feat_mat,
                        preferred_element_type=jnp.float32)        # (64, B)
        o_ref[0] = jnp.maximum(out_t + fcb_ref[...], 0.0)

    return fused_kernel


def _fc_row_permutation(C):
    """Maps kernel feature row (bin k, channel c) -> torch flatten index."""
    perm = []
    for k in range(21):
        for c in range(C):
            if k == 0:                      # level-1 global max
                perm.append(c)
            elif k <= 4:                    # level-2, bin = k-1 (row-major)
                perm.append(C + c * 4 + (k - 1))
            else:                           # level-4, bin = k-5 (row-major)
                perm.append(5 * C + c * 16 + (k - 5))
    return perm


# ---------------------------------------------------------------------------
# Wrapper
# ---------------------------------------------------------------------------
def sipnet_forward(x_nchw, params, *, compute_dtype=jnp.bfloat16,
                   block_images=None):
    N, C, H, W = x_nchw.shape
    assert H % 4 == 0 and W % 4 == 0, "pooling path assumes H, W divisible by 4"
    HW = H * W
    eps = 1e-5
    itemsize = jnp.dtype(compute_dtype).itemsize
    img_bytes = C * HW * itemsize

    # Per-step image batch: target ~0.5 MiB x-blocks, cap the unrolled
    # in-kernel image loop at 16.
    if block_images is None:
        B = max(1, min(N, 16, (512 * 1024) // max(img_bytes, 1)))
        # v7x has 2 TensorCores: keep >= 2 grid steps when blocks are sizeable.
        if N > 1 and -(-N // B) == 1 and N * img_bytes > (128 * 1024):
            B = -(-N // 2)
    else:
        B = max(1, min(block_images, N))
    nb = -(-N // B)
    Npad = nb * B

    # Lane-dense (C, H*W) per image; x stored as bf16 (MXU native), f32 accum.
    x3 = x_nchw.reshape(N, C, HW).astype(compute_dtype)
    if Npad != N:
        # Zero images: contribute nothing to BN stats; padded rows sliced off.
        x3 = jnp.pad(x3, ((0, Npad - N), (0, 0), (0, 0)))

    conv_w = params["conv_w"].astype(compute_dtype)      # (Cout, Cin)
    gamma = params["bn_gamma"].astype(jnp.float32)
    beta = params["bn_beta"].astype(jnp.float32)
    # params["conv_b"] intentionally unused: the conv bias cancels exactly in
    # the training-mode BatchNorm mean subtraction.

    cparams = pltpu.CompilerParams(
        dimension_semantics=("parallel",),
        vmem_limit_bytes=48 * 1024 * 1024)   # explicit; safe on v7x (64 MiB)

    # ---- pass 1: x-Gram + channel sums (merged small output) ----
    stats = pl.pallas_call(
        _make_stats_kernel(B, C),
        out_shape=jax.ShapeDtypeStruct((nb, C, C + 1), jnp.float32),
        grid=(nb,),
        in_specs=[pl.BlockSpec((B, C, HW), lambda n: (n, 0, 0))],
        out_specs=pl.BlockSpec((1, C, C + 1), lambda n: (n, 0, 0)),
        compiler_params=cparams,
        cost_estimate=pl.CostEstimate(
            flops=2 * Npad * C * C * HW + Npad * C * HW,
            transcendentals=0,
            bytes_accessed=itemsize * Npad * C * HW + 4 * nb * C * (C + 1)),
    )(x3)

    # ---- BN scale/shift finalisation (tiny, plain JAX, once per batch) ----
    tot = jnp.sum(stats, axis=0)                         # (C, C+1)
    gram = tot[:, :C]                                    # sum_pixels x x^T
    sx = tot[:, C:]                                      # (C, 1) sum_pixels x
    m = float(N * H * W)
    wf = conv_w.astype(jnp.float32)
    mean_z = (wf @ sx) / m                               # (C, 1)
    gram_c = gram - (sx @ sx.T) / m                      # centered 2nd moment
    var = jnp.sum((wf @ gram_c) * wf, axis=1) / m        # (C,)
    var = jnp.maximum(var, 0.0)                          # fp safety
    scale = gamma * lax.rsqrt(var + eps)                 # (C,)
    shift = beta - scale * mean_z[:, 0]                  # (C,)
    ss = jnp.stack([scale, shift], axis=1)               # (C, 2)

    # ---- FC weight: permute torch rows to the kernel's (bin, channel) order
    #      and pre-transpose so the kernel does one (64,21C)@(21C,B) matmul.
    fc_w = params["fc_w"].astype(jnp.float32)            # (21*C, 64) torch order
    perm = jnp.asarray(_fc_row_permutation(C), dtype=jnp.int32)
    fc_wt = fc_w[perm, :].T                              # (64, 21*C)
    fc_b = params["fc_b"].astype(jnp.float32).reshape(64, 1)

    # ---- pass 2: fused conv + BN + ReLU + SPP + Linear + ReLU ----
    out3 = pl.pallas_call(
        _make_fused_kernel(B, C, H, W),
        out_shape=jax.ShapeDtypeStruct((nb, 64, B), jnp.float32),
        grid=(nb,),
        in_specs=[
            pl.BlockSpec((B, C, HW), lambda n: (n, 0, 0)),   # x block
            pl.BlockSpec((C, C), lambda n: (0, 0)),          # conv weight
            pl.BlockSpec((C, 2), lambda n: (0, 0)),          # BN scale/shift
            pl.BlockSpec((64, 21 * C), lambda n: (0, 0)),    # FC weight (perm, T)
            pl.BlockSpec((64, 1), lambda n: (0, 0)),         # FC bias
        ],
        out_specs=pl.BlockSpec((1, 64, B), lambda n: (n, 0, 0)),
        compiler_params=cparams,
        cost_estimate=pl.CostEstimate(
            flops=(2 * Npad * C * C * HW + 4 * Npad * C * HW
                   + 2 * Npad * 21 * C * 64),
            transcendentals=0,
            bytes_accessed=(itemsize * (Npad * C * HW + C * C)
                            + 4 * (2 * C + 64 * 21 * C + 64 + Npad * 64))),
    )(x3, conv_w, ss, fc_wt, fc_b)

    out = out3.transpose(0, 2, 1).reshape(Npad, 64)
    return out[:N]


def init_params(dim_in, key):
    k1, k2, k3, k4, k5, k6 = jax.random.split(key, 6)
    fan_fc = dim_in * 21
    return {
        # conv_w[co, ci] corresponds to torch conv1[0].weight[co, ci, 0, 0]
        "conv_w": 0.5 * jax.random.normal(k1, (dim_in, dim_in), jnp.float32),
        # present in the torch module; cancels under training-mode BatchNorm.
        "conv_b": 0.1 * jax.random.normal(k2, (dim_in,), jnp.float32),
        "bn_gamma": 1.0 + 0.1 * jax.random.normal(k3, (dim_in,), jnp.float32),
        "bn_beta": 0.1 * jax.random.normal(k4, (dim_in,), jnp.float32),
        # fc_w is torch fc1[0].weight (64, 21*dim_in) transposed -> (21*dim_in, 64)
        "fc_w": (1.0 / math.sqrt(fan_fc))
        * jax.random.normal(k5, (fan_fc, 64), jnp.float32),
        "fc_b": 0.1 * jax.random.normal(k6, (64,), jnp.float32),
    }


# Pure-JAX reference of the torch forward (training-mode BN), used as a sanity
# check; inputs are rounded to `compute_dtype` to mirror the kernel's storage.
def _reference_forward(x, params, compute_dtype=jnp.bfloat16):
    N, C, H, W = x.shape
    xr = x.astype(compute_dtype).astype(jnp.float32)
    w = params["conv_w"].astype(compute_dtype).astype(jnp.float32)
    b = params["conv_b"].astype(jnp.float32)
    z = jnp.einsum("oc,nchw->nohw", w, xr) + b[None, :, None, None]
    mean = z.mean(axis=(0, 2, 3))
    var = z.var(axis=(0, 2, 3))
    zn = (z - mean[None, :, None, None]) * lax.rsqrt(var + 1e-5)[None, :, None, None]
    y = jnp.maximum(zn * params["bn_gamma"][None, :, None, None]
                    + params["bn_beta"][None, :, None, None], 0.0)
    l1 = y.max(axis=(2, 3)).reshape(N, C)
    l2 = y.reshape(N, C, 2, H // 2, 2, W // 2).max(axis=(3, 5)).reshape(N, 4 * C)
    l4 = y.reshape(N, C, 4, H // 4, 4, W // 4).max(axis=(3, 5)).reshape(N, 16 * C)
    feats = jnp.concatenate([l1, l2, l4], axis=1)
    return jnp.maximum(feats @ params["fc_w"] + params["fc_b"], 0.0)


if __name__ == "__main__":
    key = jax.random.PRNGKey(0)
    kx, kp = jax.random.split(key)

    N, C, H, W = 2, 4, 16, 16
    x = jax.random.normal(kx, (N, C, H, W), jnp.float32)
    params = init_params(C, kp)

    out = jax.jit(sipnet_forward)(x, params)
    out = jax.block_until_ready(out)
    assert out.shape == (N, 64), out.shape
    assert bool(jnp.all(jnp.isfinite(out)))

    ref = _reference_forward(x, params)
    err = float(jnp.max(jnp.abs(out - ref)))
    assert bool(jnp.allclose(out, ref, rtol=2e-2, atol=2e-2)), err

    print("KERNEL_OK")
</pallas_src>

<mosaic_0001>
module attributes {stable_mosaic.version = 11 : i64} {
  func.func @stats_kernel(%arg0: i32, %arg1: memref<2x4x256xbf16, #tpu.memory_space<vmem>>, %arg2: memref<1x4x5xf32, #tpu.memory_space<vmem>>) attributes {dimension_semantics = [#tpu.dimension_semantics<parallel>], iteration_bounds = array<i64: 1>, scalar_prefetch = 0 : i64, scratch_operands = 0 : i64, tpu.core_type = #tpu.core_type<tc>, window_params = [{transform_indices = @transform_0, window_bounds = array<i64: 2, 4, 256>}, {transform_indices = @transform_1, window_bounds = array<i64: 1, 4, 5>}]} {
    %cst = arith.constant 0.000000e+00 : f32
    %0 = vector.broadcast %cst : f32 to vector<4x4xf32>
    %cst_0 = arith.constant 0.000000e+00 : f32
    %1 = vector.broadcast %cst_0 : f32 to vector<4x1xf32>
    %c0 = arith.constant 0 : index
    %c0_1 = arith.constant 0 : index
    %c0_2 = arith.constant 0 : index
    %2 = vector.load %arg1[%c0, %c0_1, %c0_2] : memref<2x4x256xbf16, #tpu.memory_space<vmem>>, vector<1x4x256xbf16>
    %3 = vector.shape_cast %2 : vector<1x4x256xbf16> to vector<4x256xbf16>
    %cst_3 = arith.constant dense<0.000000e+00> : vector<4x4xf32>
    %4 = tpu.matmul %3, %3, %cst_3 {dimension_numbers = #tpu.dot_dimension_numbers<[1], [1], [0], [0], [0, 0, 1, 0], [], []>} : vector<4x256xbf16>, vector<4x256xbf16>, vector<4x4xf32> -> vector<4x4xf32>
    %5 = arith.addf %0, %4 : vector<4x4xf32>
    %6 = arith.extf %3 : vector<4x256xbf16> to vector<4x256xf32>
    %cst_4 = arith.constant dense<0.000000e+00> : vector<4xf32>
    %7 = vector.multi_reduction <add>, %6, %cst_4 [1] : vector<4x256xf32> to vector<4xf32>
    %8 = vector.shape_cast %7 : vector<4xf32> to vector<4x1xf32>
    %9 = arith.addf %1, %8 : vector<4x1xf32>
    %c1 = arith.constant 1 : index
    %c0_5 = arith.constant 0 : index
    %c0_6 = arith.constant 0 : index
    %10 = vector.load %arg1[%c1, %c0_5, %c0_6] : memref<2x4x256xbf16, #tpu.memory_space<vmem>>, vector<1x4x256xbf16>
    %11 = vector.shape_cast %10 : vector<1x4x256xbf16> to vector<4x256xbf16>
    %cst_7 = arith.constant dense<0.000000e+00> : vector<4x4xf32>
    %12 = tpu.matmul %11, %11, %cst_7 {dimension_numbers = #tpu.dot_dimension_numbers<[1], [1], [0], [0], [0, 0, 1, 0], [], []>} : vector<4x256xbf16>, vector<4x256xbf16>, vector<4x4xf32> -> vector<4x4xf32>
    %13 = arith.addf %5, %12 : vector<4x4xf32>
    %14 = arith.extf %11 : vector<4x256xbf16> to vector<4x256xf32>
    %cst_8 = arith.constant dense<0.000000e+00> : vector<4xf32>
    %15 = vector.multi_reduction <add>, %14, %cst_8 [1] : vector<4x256xf32> to vector<4xf32>
    %16 = vector.shape_cast %15 : vector<4xf32> to vector<4x1xf32>
    %17 = arith.addf %9, %16 : vector<4x1xf32>
    %18 = tpu.concatenate %13, %17 in 1 : vector<4x4xf32>, vector<4x1xf32> -> vector<4x5xf32>
    %c0_9 = arith.constant 0 : index
    %c0_10 = arith.constant 0 : index
    %c0_11 = arith.constant 0 : index
    %19 = vector.load %arg2[%c0_9, %c0_10, %c0_11] : memref<1x4x5xf32, #tpu.memory_space<vmem>>, vector<1x4x5xf32>
    %20 = vector.shape_cast %19 : vector<1x4x5xf32> to vector<4x5xf32>
    %21 = vector.shape_cast %18 : vector<4x5xf32> to vector<1x4x5xf32>
    tpu.vector_store %arg2[%c0_9, %c0_10, %c0_11], %21 {strides = array<i32>} : memref<1x4x5xf32, #tpu.memory_space<vmem>>, vector<1x4x5xf32>,
    return
  }
  func.func @transform_0(%arg0: i32) -> (i32, i32, i32) {
    %c0_i32 = arith.constant 0 : i32
    %c0_i32_0 = arith.constant 0 : i32
    %c0_i32_1 = arith.constant 0 : i32
    return %arg0, %c0_i32, %c0_i32_0 : i32, i32, i32
  }
  func.func @transform_1(%arg0: i32) -> (i32, i32, i32) {
    %c0_i32 = arith.constant 0 : i32
    %c0_i32_0 = arith.constant 0 : i32
    %c0_i32_1 = arith.constant 0 : i32
    return %arg0, %c0_i32, %c0_i32_0 : i32, i32, i32
  }
}

module attributes {stable_mosaic.version = 11 : i64} {
  func.func @fused_kernel(%arg0: i32, %arg1: memref<2x4x256xbf16, #tpu.memory_space<vmem>>, %arg2: memref<4x4xbf16, #tpu.memory_space<vmem>>, %arg3: memref<4x2xf32, #tpu.memory_space<vmem>>, %arg4: memref<64x84xf32, #tpu.memory_space<vmem>>, %arg5: memref<64x1xf32, #tpu.memory_space<vmem>>, %arg6: memref<1x64x2xf32, #tpu.memory_space<vmem>>) attributes {dimension_semantics = [#tpu.dimension_semantics<parallel>], iteration_bounds = array<i64: 1>, scalar_prefetch = 0 : i64, scratch_operands = 0 : i64, tpu.core_type = #tpu.core_type<tc>, window_params = [{transform_indices = @transform_0, window_bounds = array<i64: 2, 4, 256>}, {pipeline_mode = #tpu.pipeline_mode<synchronous>, transform_indices = @transform_1, window_bounds = array<i64: 4, 4>}, {pipeline_mode = #tpu.pipeline_mode<synchronous>, transform_indices = @transform_2, window_bounds = array<i64: 4, 2>}, {pipeline_mode = #tpu.pipeline_mode<synchronous>, transform_indices = @transform_3, window_bounds = array<i64: 64, 84>}, {pipeline_mode = #tpu.pipeline_mode<synchronous>, transform_indices = @transform_4, window_bounds = array<i64: 64, 1>}, {transform_indices = @transform_5, window_bounds = array<i64: 1, 64, 2>}]} {
    %c0 = arith.constant 0 : index
    %c0_0 = arith.constant 0 : index
    %0 = vector.load %arg2[%c0, %c0_0] : memref<4x4xbf16, #tpu.memory_space<vmem>>, vector<4x4xbf16>
    %c0_1 = arith.constant 0 : index
    %c0_2 = arith.constant 0 : index
    %1 = vector.load %arg3[%c0_1, %c0_2] : memref<4x2xf32, #tpu.memory_space<vmem>>, vector<4x1xf32>
    %c0_3 = arith.constant 0 : index
    %c1 = arith.constant 1 : index
    %2 = vector.load %arg3[%c0_3, %c1] : memref<4x2xf32, #tpu.memory_space<vmem>>, vector<4x1xf32>
    %c0_4 = arith.constant 0 : index
    %c0_5 = arith.constant 0 : index
    %c0_6 = arith.constant 0 : index
    %3 = vector.load %arg1[%c0_4, %c0_5, %c0_6] : memref<2x4x256xbf16, #tpu.memory_space<vmem>>, vector<1x4x256xbf16>
    %4 = vector.shape_cast %3 : vector<1x4x256xbf16> to vector<4x256xbf16>
    %cst = arith.constant dense<0.000000e+00> : vector<4x256xf32>
    %5 = tpu.matmul %0, %4, %cst {dimension_numbers = #tpu.dot_dimension_numbers<[1], [0], [0], [1], [0, 0, 1, 1], [], []>} : vector<4x4xbf16>, vector<4x256xbf16>, vector<4x256xf32> -> vector<4x256xf32>
    %6 = vector.broadcast %1 : vector<4x1xf32> to vector<4x256xf32>
    %7 = arith.mulf %5, %6 : vector<4x256xf32>
    %8 = vector.broadcast %2 : vector<4x1xf32> to vector<4x256xf32>
    %9 = arith.addf %7, %8 : vector<4x256xf32>
    %cst_7 = arith.constant 0.000000e+00 : f32
    %10 = vector.broadcast %cst_7 : f32 to vector<4x256xf32>
    %11 = arith.maximumf %9, %10 : vector<4x256xf32>
    %12 = vector.extract_strided_slice %11 {offsets = [0, 0], sizes = [4, 16], strides = [1, 1]} : vector<4x256xf32> to vector<4x16xf32>
    %13 = vector.extract_strided_slice %11 {offsets = [0, 16], sizes = [4, 16], strides = [1, 1]} : vector<4x256xf32> to vector<4x16xf32>
    %14 = arith.maximumf %12, %13 : vector<4x16xf32>
    %15 = vector.extract_strided_slice %11 {offsets = [0, 32], sizes = [4, 16], strides = [1, 1]} : vector<4x256xf32> to vector<4x16xf32>
    %16 = arith.maximumf %14, %15 : vector<4x16xf32>
    %17 = vector.extract_strided_slice %11 {offsets = [0, 48], sizes = [4, 16], strides = [1, 1]} : vector<4x256xf32> to vector<4x16xf32>
    %18 = arith.maximumf %16, %17 : vector<4x16xf32>
    %19 = vector.extract_strided_slice %18 {offsets = [0, 0], sizes = [4, 4], strides = [1, 1]} : vector<4x16xf32> to vector<4x4xf32>
    %cst_8 = arith.constant dense<0xFF800000> : vector<4xf32>
    %20 = vector.multi_reduction <maximumf>, %19, %cst_8 [1] : vector<4x4xf32> to vector<4xf32>
    %21 = vector.shape_cast %20 : vector<4xf32> to vector<4x1xf32>
    %22 = vector.extract_strided_slice %18 {offsets = [0, 4], sizes = [4, 4], strides = [1, 1]} : vector<4x16xf32> to vector<4x4xf32>
    %cst_9 = arith.constant dense<0xFF800000> : vector<4xf32>
    %23 = vector.multi_reduction <maximumf>, %22, %cst_9 [1] : vector<4x4xf32> to vector<4xf32>
    %24 = vector.shape_cast %23 : vector<4xf32> to vector<4x1xf32>
    %25 = vector.extract_strided_slice %18 {offsets = [0, 8], sizes = [4, 4], strides = [1, 1]} : vector<4x16xf32> to vector<4x4xf32>
    %cst_10 = arith.constant dense<0xFF800000> : vector<4xf32>
    %26 = vector.multi_reduction <maximumf>, %25, %cst_10 [1] : vector<4x4xf32> to vector<4xf32>
    %27 = vector.shape_cast %26 : vector<4xf32> to vector<4x1xf32>
    %28 = vector.extract_strided_slice %18 {offsets = [0, 12], sizes = [4, 4], strides = [1, 1]} : vector<4x16xf32> to vector<4x4xf32>
    %cst_11 = arith.constant dense<0xFF800000> : vector<4xf32>
    %29 = vector.multi_reduction <maximumf>, %28, %cst_11 [1] : vector<4x4xf32> to vector<4xf32>
    %30 = vector.shape_cast %29 : vector<4xf32> to vector<4x1xf32>
    %31 = vector.extract_strided_slice %11 {offsets = [0, 64], sizes = [4, 16], strides = [1, 1]} : vector<4x256xf32> to vector<4x16xf32>
    %32 = vector.extract_strided_slice %11 {offsets = [0, 80], sizes = [4, 16], strides = [1, 1]} : vector<4x256xf32> to vector<4x16xf32>
    %33 = arith.maximumf %31, %32 : vector<4x16xf32>
    %34 = vector.extract_strided_slice %11 {offsets = [0, 96], sizes = [4, 16], strides = [1, 1]} : vector<4x256xf32> to vector<4x16xf32>
    %35 = arith.maximumf %33, %34 : vector<4x16xf32>
    %36 = vector.extract_strided_slice %11 {offsets = [0, 112], sizes = [4, 16], strides = [1, 1]} : vector<4x256xf32> to vector<4x16xf32>
    %37 = arith.maximumf %35, %36 : vector<4x16xf32>
    %38 = vector.extract_strided_slice %37 {offsets = [0, 0], sizes = [4, 4], strides = [1, 1]} : vector<4x16xf32> to vector<4x4xf32>
    %cst_12 = arith.constant dense<0xFF800000> : vector<4xf32>
    %39 = vector.multi_reduction <maximumf>, %38, %cst_12 [1] : vector<4x4xf32> to vector<4xf32>
    %40 = vector.shape_cast %39 : vector<4xf32> to vector<4x1xf32>
    %41 = vector.extract_strided_slice %37 {offsets = [0, 4], sizes = [4, 4], strides = [1, 1]} : vector<4x16xf32> to vector<4x4xf32>
    %cst_13 = arith.constant dense<0xFF800000> : vector<4xf32>
    %42 = vector.multi_reduction <maximumf>, %41, %cst_13 [1] : vector<4x4xf32> to vector<4xf32>
    %43 = vector.shape_cast %42 : vector<4xf32> to vector<4x1xf32>
    %44 = vector.extract_strided_slice %37 {offsets = [0, 8], sizes = [4, 4], strides = [1, 1]} : vector<4x16xf32> to vector<4x4xf32>
    %cst_14 = arith.constant dense<0xFF800000> : vector<4xf32>
    %45 = vector.multi_reduction <maximumf>, %44, %cst_14 [1] : vector<4x4xf32> to vector<4xf32>
    %46 = vector.shape_cast %45 : vector<4xf32> to vector<4x1xf32>
    %47 = vector.extract_strided_slice %37 {offsets = [0, 12], sizes = [4, 4], strides = [1, 1]} : vector<4x16xf32> to vector<4x4xf32>
    %cst_15 = arith.constant dense<0xFF800000> : vector<4xf32>
    %48 = vector.multi_reduction <maximumf>, %47, %cst_15 [1] : vector<4x4xf32> to vector<4xf32>
    %49 = vector.shape_cast %48 : vector<4xf32> to vector<4x1xf32>
    %50 = vector.extract_strided_slice %11 {offsets = [0, 128], sizes = [4, 16], strides = [1, 1]} : vector<4x256xf32> to vector<4x16xf32>
    %51 = vector.extract_strided_slice %11 {offsets = [0, 144], sizes = [4, 16], strides = [1, 1]} : vector<4x256xf32> to vector<4x16xf32>
    %52 = arith.maximumf %50, %51 : vector<4x16xf32>
    %53 = vector.extract_strided_slice %11 {offsets = [0, 160], sizes = [4, 16], strides = [1, 1]} : vector<4x256xf32> to vector<4x16xf32>
    %54 = arith.maximumf %52, %53 : vector<4x16xf32>
    %55 = vector.extract_strided_slice %11 {offsets = [0, 176], sizes = [4, 16], strides = [1, 1]} : vector<4x256xf32> to vector<4x16xf32>
    %56 = arith.maximumf %54, %55 : vector<4x16xf32>
    %57 = vector.extract_strided_slice %56 {offsets = [0, 0], sizes = [4, 4], strides = [1, 1]} : vector<4x16xf32> to vector<4x4xf32>
    %cst_16 = arith.constant dense<0xFF800000> : vector<4xf32>
    %58 = vector.multi_reduction <maximumf>, %57, %cst_16 [1] : vector<4x4xf32> to vector<4xf32>
    %59 = vector.shape_cast %58 : vector<4xf32> to vector<4x1xf32>
    %60 = vector.extract_strided_slice %56 {offsets = [0, 4], sizes = [4, 4], strides = [1, 1]} : vector<4x16xf32> to vector<4x4xf32>
    %cst_17 = arith.constant dense<0xFF800000> : vector<4xf32>
    %61 = vector.multi_reduction <maximumf>, %60, %cst_17 [1] : vector<4x4xf32> to vector<4xf32>
    %62 = vector.shape_cast %61 : vector<4xf32> to vector<4x1xf32>
    %63 = vector.extract_strided_slice %56 {offsets = [0, 8], sizes = [4, 4], strides = [1, 1]} : vector<4x16xf32> to vector<4x4xf32>
    %cst_18 = arith.constant dense<0xFF800000> : vector<4xf32>
    %64 = vector.multi_reduction <maximumf>, %63, %cst_18 [1] : vector<4x4xf32> to vector<4xf32>
    %65 = vector.shape_cast %64 : vector<4xf32> to vector<4x1xf32>
    %66 = vector.extract_strided_slice %56 {offsets = [0, 12], sizes = [4, 4], strides = [1, 1]} : vector<4x16xf32> to vector<4x4xf32>
    %cst_19 = arith.constant dense<0xFF800000> : vector<4xf32>
    %67 = vector.multi_reduction <maximumf>, %66, %cst_19 [1] : vector<4x4xf32> to vector<4xf32>
    %68 = vector.shape_cast %67 : vector<4xf32> to vector<4x1xf32>
    %69 = vector.extract_strided_slice %11 {offsets = [0, 192], sizes = [4, 16], strides = [1, 1]} : vector<4x256xf32> to vector<4x16xf32>
    %70 = vector.extract_strided_slice %11 {offsets = [0, 208], sizes = [4, 16], strides = [1, 1]} : vector<4x256xf32> to vector<4x16xf32>
    %71 = arith.maximumf %69, %70 : vector<4x16xf32>
    %72 = vector.extract_strided_slice %11 {offsets = [0, 224], sizes = [4, 16], strides = [1, 1]} : vector<4x256xf32> to vector<4x16xf32>
    %73 = arith.maximumf %71, %72 : vector<4x16xf32>
    %74 = vector.extract_strided_slice %11 {offsets = [0, 240], sizes = [4, 16], strides = [1, 1]} : vector<4x256xf32> to vector<4x16xf32>
    %75 = arith.maximumf %73, %74 : vector<4x16xf32>
    %76 = vector.extract_strided_slice %75 {offsets = [0, 0], sizes = [4, 4], strides = [1, 1]} : vector<4x16xf32> to vector<4x4xf32>
    %cst_20 = arith.constant dense<0xFF800000> : vector<4xf32>
    %77 = vector.multi_reduction <maximumf>, %76, %cst_20 [1] : vector<4x4xf32> to vector<4xf32>
    %78 = vector.shape_cast %77 : vector<4xf32> to vector<4x1xf32>
    %79 = vector.extract_strided_slice %75 {offsets = [0, 4], sizes = [4, 4], strides = [1, 1]} : vector<4x16xf32> to vector<4x4xf32>
    %cst_21 = arith.constant dense<0xFF800000> : vector<4xf32>
    %80 = vector.multi_reduction <maximumf>, %79, %cst_21 [1] : vector<4x4xf32> to vector<4xf32>
    %81 = vector.shape_cast %80 : vector<4xf32> to vector<4x1xf32>
    %82 = vector.extract_strided_slice %75 {offsets = [0, 8], sizes = [4, 4], strides = [1, 1]} : vector<4x16xf32> to vector<4x4xf32>
    %cst_22 = arith.constant dense<0xFF800000> : vector<4xf32>
    %83 = vector.multi_reduction <maximumf>, %82, %cst_22 [1] : vector<4x4xf32> to vector<4xf32>
    %84 = vector.shape_cast %83 : vector<4xf32> to vector<4x1xf32>
    %85 = vector.extract_strided_slice %75 {offsets = [0, 12], sizes = [4, 4], strides = [1, 1]} : vector<4x16xf32> to vector<4x4xf32>
    %cst_23 = arith.constant dense<0xFF800000> : vector<4xf32>
    %86 = vector.multi_reduction <maximumf>, %85, %cst_23 [1] : vector<4x4xf32> to vector<4xf32>
    %87 = vector.shape_cast %86 : vector<4xf32> to vector<4x1xf32>
    %88 = arith.maximumf %21, %24 : vector<4x1xf32>
    %89 = arith.maximumf %40, %43 : vector<4x1xf32>
    %90 = arith.maximumf %88, %89 : vector<4x1xf32>
    %91 = arith.maximumf %27, %30 : vector<4x1xf32>
    %92 = arith.maximumf %46, %49 : vector<4x1xf32>
    %93 = arith.maximumf %91, %92 : vector<4x1xf32>
    %94 = arith.maximumf %59, %62 : vector<4x1xf32>
    %95 = arith.maximumf %78, %81 : vector<4x1xf32>
    %96 = arith.maximumf %94, %95 : vector<4x1xf32>
    %97 = arith.maximumf %65, %68 : vector<4x1xf32>
    %98 = arith.maximumf %84, %87 : vector<4x1xf32>
    %99 = arith.maximumf %97, %98 : vector<4x1xf32>
    %100 = arith.maximumf %90, %93 : vector<4x1xf32>
    %101 = arith.maximumf %96, %99 : vector<4x1xf32>
    %102 = arith.maximumf %100, %101 : vector<4x1xf32>
    %103 = tpu.concatenate %102, %90, %93, %96, %99, %21, %24, %27, %30, %40, %43, %46, %49, %59, %62, %65 in 0 : vector<4x1xf32>, vector<4x1xf32>, vector<4x1xf32>, vector<4x1xf32>, vector<4x1xf32>, vector<4x1xf32>, vector<4x1xf32>, vector<4x1xf32>, vector<4x1xf32>, vector<4x1xf32>, vector<4x1xf32>, vector<4x1xf32>, vector<4x1xf32>, vector<4x1xf32>, vector<4x1xf32>, vector<4x1xf32> -> vector<64x1xf32>
    %104 = tpu.concatenate %68, %78, %81, %84, %87 in 0 : vector<4x1xf32>, vector<4x1xf32>, vector<4x1xf32>, vector<4x1xf32>, vector<4x1xf32> -> vector<20x1xf32>
    %105 = tpu.concatenate %103, %104 in 0 : vector<64x1xf32>, vector<20x1xf32> -> vector<84x1xf32>
    %c1_24 = arith.constant 1 : index
    %c0_25 = arith.constant 0 : index
    %c0_26 = arith.constant 0 : index
    %106 = vector.load %arg1[%c1_24, %c0_25, %c0_26] : memref<2x4x256xbf16, #tpu.memory_space<vmem>>, vector<1x4x256xbf16>
    %107 = vector.shape_cast %106 : vector<1x4x256xbf16> to vector<4x256xbf16>
    %cst_27 = arith.constant dense<0.000000e+00> : vector<4x256xf32>
    %108 = tpu.matmul %0, %107, %cst_27 {dimension_numbers = #tpu.dot_dimension_numbers<[1], [0], [0], [1], [0, 0, 1, 1], [], []>} : vector<4x4xbf16>, vector<4x256xbf16>, vector<4x256xf32> -> vector<4x256xf32>
    %109 = vector.broadcast %1 : vector<4x1xf32> to vector<4x256xf32>
    %110 = arith.mulf %108, %109 : vector<4x256xf32>
    %111 = vector.broadcast %2 : vector<4x1xf32> to vector<4x256xf32>
    %112 = arith.addf %110, %111 : vector<4x256xf32>
    %cst_28 = arith.constant 0.000000e+00 : f32
    %113 = vector.broadcast %cst_28 : f32 to vector<4x256xf32>
    %114 = arith.maximumf %112, %113 : vector<4x256xf32>
    %115 = vector.extract_strided_slice %114 {offsets = [0, 0], sizes = [4, 16], strides = [1, 1]} : vector<4x256xf32> to vector<4x16xf32>
    %116 = vector.extract_strided_slice %114 {offsets = [0, 16], sizes = [4, 16], strides = [1, 1]} : vector<4x256xf32> to vector<4x16xf32>
    %117 = arith.maximumf %115, %116 : vector<4x16xf32>
    %118 = vector.extract_strided_slice %114 {offsets = [0, 32], sizes = [4, 16], strides = [1, 1]} : vector<4x256xf32> to vector<4x16xf32>
    %119 = arith.maximumf %117, %118 : vector<4x16xf32>
    %120 = vector.extract_strided_slice %114 {offsets = [0, 48], sizes = [4, 16], strides = [1, 1]} : vector<4x256xf32> to vector<4x16xf32>
    %121 = arith.maximumf %119, %120 : vector<4x16xf32>
    %122 = vector.extract_strided_slice %121 {offsets = [0, 0], sizes = [4, 4], strides = [1, 1]} : vector<4x16xf32> to vector<4x4xf32>
    %cst_29 = arith.constant dense<0xFF800000> : vector<4xf32>
    %123 = vector.multi_reduction <maximumf>, %122, %cst_29 [1] : vector<4x4xf32> to vector<4xf32>
    %124 = vector.shape_cast %123 : vector<4xf32> to vector<4x1xf32>
    %125 = vector.extract_strided_slice %121 {offsets = [0, 4], sizes = [4, 4], strides = [1, 1]} : vector<4x16xf32> to vector<4x4xf32>
    %cst_30 = arith.constant dense<0xFF800000> : vector<4xf32>
    %126 = vector.multi_reduction <maximumf>, %125, %cst_30 [1] : vector<4x4xf32> to vector<4xf32>
    %127 = vector.shape_cast %126 : vector<4xf32> to vector<4x1xf32>
    %128 = vector.extract_strided_slice %121 {offsets = [0, 8], sizes = [4, 4], strides = [1, 1]} : vector<4x16xf32> to vector<4x4xf32>
    %cst_31 = arith.constant dense<0xFF800000> : vector<4xf32>
    %129 = vector.multi_reduction <maximumf>, %128, %cst_31 [1] : vector<4x4xf32> to vector<4xf32>
    %130 = vector.shape_cast %129 : vector<4xf32> to vector<4x1xf32>
    %131 = vector.extract_strided_slice %121 {offsets = [0, 12], sizes = [4, 4], strides = [1, 1]} : vector<4x16xf32> to vector<4x4xf32>
    %cst_32 = arith.constant dense<0xFF800000> : vector<4xf32>
    %132 = vector.multi_reduction <maximumf>, %131, %cst_32 [1] : vector<4x4xf32> to vector<4xf32>
    %133 = vector.shape_cast %132 : vector<4xf32> to vector<4x1xf32>
    %134 = vector.extract_strided_slice %114 {offsets = [0, 64], sizes = [4, 16], strides = [1, 1]} : vector<4x256xf32> to vector<4x16xf32>
    %135 = vector.extract_strided_slice %114 {offsets = [0, 80], sizes = [4, 16], strides = [1, 1]} : vector<4x256xf32> to vector<4x16xf32>
    %136 = arith.maximumf %134, %135 : vector<4x16xf32>
    %137 = vector.extract_strided_slice %114 {offsets = [0, 96], sizes = [4, 16], strides = [1, 1]} : vector<4x256xf32> to vector<4x16xf32>
    %138 = arith.maximumf %136, %137 : vector<4x16xf32>
    %139 = vector.extract_strided_slice %114 {offsets = [0, 112], sizes = [4, 16], strides = [1, 1]} : vector<4x256xf32> to vector<4x16xf32>
    %140 = arith.maximumf %138, %139 : vector<4x16xf32>
    %141 = vector.extract_strided_slice %140 {offsets = [0, 0], sizes = [4, 4], strides = [1, 1]} : vector<4x16xf32> to vector<4x4xf32>
    %cst_33 = arith.constant dense<0xFF800000> : vector<4xf32>
    %142 = vector.multi_reduction <maximumf>, %141, %cst_33 [1] : vector<4x4xf32> to vector<4xf32>
    %143 = vector.shape_cast %142 : vector<4xf32> to vector<4x1xf32>
    %144 = vector.extract_strided_slice %140 {offsets = [0, 4], sizes = [4, 4], strides = [1, 1]} : vector<4x16xf32> to vector<4x4xf32>
    %cst_34 = arith.constant dense<0xFF800000> : vector<4xf32>
    %145 = vector.multi_reduction <maximumf>, %144, %cst_34 [1] : vector<4x4xf32> to vector<4xf32>
    %146 = vector.shape_cast %145 : vector<4xf32> to vector<4x1xf32>
    %147 = vector.extract_strided_slice %140 {offsets = [0, 8], sizes = [4, 4], strides = [1, 1]} : vector<4x16xf32> to vector<4x4xf32>
    %cst_35 = arith.constant dense<0xFF800000> : vector<4xf32>
    %148 = vector.multi_reduction <maximumf>, %147, %cst_35 [1] : vector<4x4xf32> to vector<4xf32>
    %149 = vector.shape_cast %148 : vector<4xf32> to vector<4x1xf32>
    %150 = vector.extract_strided_slice %140 {offsets = [0, 12], sizes = [4, 4], strides = [1, 1]} : vector<4x16xf32> to vector<4x4xf32>
    %cst_36 = arith.constant dense<0xFF800000> : vector<4xf32>
    %151 = vector.multi_reduction <maximumf>, %150, %cst_36 [1] : vector<4x4xf32> to vector<4xf32>
    %152 = vector.shape_cast %151 : vector<4xf32> to vector<4x1xf32>
    %153 = vector.extract_strided_slice %114 {offsets = [0, 128], sizes = [4, 16], strides = [1, 1]} : vector<4x256xf32> to vector<4x16xf32>
    %154 = vector.extract_strided_slice %114 {offsets = [0, 144], sizes = [4, 16], strides = [1, 1]} : vector<4x256xf32> to vector<4x16xf32>
    %155 = arith.maximumf %153, %154 : vector<4x16xf32>
    %156 = vector.extract_strided_slice %114 {offsets = [0, 160], sizes = [4, 16], strides = [1, 1]} : vector<4x256xf32> to vector<4x16xf32>
    %157 = arith.maximumf %155, %156 : vector<4x16xf32>
    %158 = vector.extract_strided_slice %114 {offsets = [0, 176], sizes = [4, 16], strides = [1, 1]} : vector<4x256xf32> to vector<4x16xf32>
    %159 = arith.maximumf %157, %158 : vector<4x16xf32>
    %160 = vector.extract_strided_slice %159 {offsets = [0, 0], sizes = [4, 4], strides = [1, 1]} : vector<4x16xf32> to vector<4x4xf32>
    %cst_37 = arith.constant dense<0xFF800000> : vector<4xf32>
    %161 = vector.multi_reduction <maximumf>, %160, %cst_37 [1] : vector<4x4xf32> to vector<4xf32>
    %162 = vector.shape_cast %161 : vector<4xf32> to vector<4x1xf32>
    %163 = vector.extract_strided_slice %159 {offsets = [0, 4], sizes = [4, 4], strides = [1, 1]} : vector<4x16xf32> to vector<4x4xf32>
    %cst_38 = arith.constant dense<0xFF800000> : vector<4xf32>
    %164 = vector.multi_reduction <maximumf>, %163, %cst_38 [1] : vector<4x4xf32> to vector<4xf32>
    %165 = vector.shape_cast %164 : vector<4xf32> to vector<4x1xf32>
    %166 = vector.extract_strided_slice %159 {offsets = [0, 8], sizes = [4, 4], strides = [1, 1]} : vector<4x16xf32> to vector<4x4xf32>
    %cst_39 = arith.constant dense<0xFF800000> : vector<4xf32>
    %167 = vector.multi_reduction <maximumf>, %166, %cst_39 [1] : vector<4x4xf32> to vector<4xf32>
    %168 = vector.shape_cast %167 : vector<4xf32> to vector<4x1xf32>
    %169 = vector.extract_strided_slice %159 {offsets = [0, 12], sizes = [4, 4], strides = [1, 1]} : vector<4x16xf32> to vector<4x4xf32>
    %cst_40 = arith.constant dense<0xFF800000> : vector<4xf32>
    %170 = vector.multi_reduction <maximumf>, %169, %cst_40 [1] : vector<4x4xf32> to vector<4xf32>
    %171 = vector.shape_cast %170 : vector<4xf32> to vector<4x1xf32>
    %172 = vector.extract_strided_slice %114 {offsets = [0, 192], sizes = [4, 16], strides = [1, 1]} : vector<4x256xf32> to vector<4x16xf32>
    %173 = vector.extract_strided_slice %114 {offsets = [0, 208], sizes = [4, 16], strides = [1, 1]} : vector<4x256xf32> to vector<4x16xf32>
    %174 = arith.maximumf %172, %173 : vector<4x16xf32>
    %175 = vector.extract_strided_slice %114 {offsets = [0, 224], sizes = [4, 16], strides = [1, 1]} : vector<4x256xf32> to vector<4x16xf32>
    %176 = arith.maximumf %174, %175 : vector<4x16xf32>
    %177 = vector.extract_strided_slice %114 {offsets = [0, 240], sizes = [4, 16], strides = [1, 1]} : vector<4x256xf32> to vector<4x16xf32>
    %178 = arith.maximumf %176, %177 : vector<4x16xf32>
    %179 = vector.extract_strided_slice %178 {offsets = [0, 0], sizes = [4, 4], strides = [1, 1]} : vector<4x16xf32> to vector<4x4xf32>
    %cst_41 = arith.constant dense<0xFF800000> : vector<4xf32>
    %180 = vector.multi_reduction <maximumf>, %179, %cst_41 [1] : vector<4x4xf32> to vector<4xf32>
    %181 = vector.shape_cast %180 : vector<4xf32> to vector<4x1xf32>
    %182 = vector.extract_strided_slice %178 {offsets = [0, 4], sizes = [4, 4], strides = [1, 1]} : vector<4x16xf32> to vector<4x4xf32>
    %cst_42 = arith.constant dense<0xFF800000> : vector<4xf32>
    %183 = vector.multi_reduction <maximumf>, %182, %cst_42 [1] : vector<4x4xf32> to vector<4xf32>
    %184 = vector.shape_cast %183 : vector<4xf32> to vector<4x1xf32>
    %185 = vector.extract_strided_slice %178 {offsets = [0, 8], sizes = [4, 4], strides = [1, 1]} : vector<4x16xf32> to vector<4x4xf32>
    %cst_43 = arith.constant dense<0xFF800000> : vector<4xf32>
    %186 = vector.multi_reduction <maximumf>, %185, %cst_43 [1] : vector<4x4xf32> to vector<4xf32>
    %187 = vector.shape_cast %186 : vector<4xf32> to vector<4x1xf32>
    %188 = vector.extract_strided_slice %178 {offsets = [0, 12], sizes = [4, 4], strides = [1, 1]} : vector<4x16xf32> to vector<4x4xf32>
    %cst_44 = arith.constant dense<0xFF800000> : vector<4xf32>
    %189 = vector.multi_reduction <maximumf>, %188, %cst_44 [1] : vector<4x4xf32> to vector<4xf32>
    %190 = vector.shape_cast %189 : vector<4xf32> to vector<4x1xf32>
    %191 = arith.maximumf %124, %127 : vector<4x1xf32>
    %192 = arith.maximumf %143, %146 : vector<4x1xf32>
    %193 = arith.maximumf %191, %192 : vector<4x1xf32>
    %194 = arith.maximumf %130, %133 : vector<4x1xf32>
    %195 = arith.maximumf %149, %152 : vector<4x1xf32>
    %196 = arith.maximumf %194, %195 : vector<4x1xf32>
    %197 = arith.maximumf %162, %165 : vector<4x1xf32>
    %198 = arith.maximumf %181, %184 : vector<4x1xf32>
    %199 = arith.maximumf %197, %198 : vector<4x1xf32>
    %200 = arith.maximumf %168, %171 : vector<4x1xf32>
    %201 = arith.maximumf %187, %190 : vector<4x1xf32>
    %202 = arith.maximumf %200, %201 : vector<4x1xf32>
    %203 = arith.maximumf %193, %196 : vector<4x1xf32>
    %204 = arith.maximumf %199, %202 : vector<4x1xf32>
    %205 = arith.maximumf %203, %204 : vector<4x1xf32>
    %206 = tpu.concatenate %205, %193, %196, %199, %202, %124, %127, %130, %133, %143, %146, %149, %152, %162, %165, %168 in 0 : vector<4x1xf32>, vector<4x1xf32>, vector<4x1xf32>, vector<4x1xf32>, vector<4x1xf32>, vector<4x1xf32>, vector<4x1xf32>, vector<4x1xf32>, vector<4x1xf32>, vector<4x1xf32>, vector<4x1xf32>, vector<4x1xf32>, vector<4x1xf32>, vector<4x1xf32>, vector<4x1xf32>, vector<4x1xf32> -> vector<64x1xf32>
    %207 = tpu.concatenate %171, %181, %184, %187, %190 in 0 : vector<4x1xf32>, vector<4x1xf32>, vector<4x1xf32>, vector<4x1xf32>, vector<4x1xf32> -> vector<20x1xf32>
    %208 = tpu.concatenate %206, %207 in 0 : vector<64x1xf32>, vector<20x1xf32> -> vector<84x1xf32>
    %209 = tpu.concatenate %105, %208 in 1 : vector<84x1xf32>, vector<84x1xf32> -> vector<84x2xf32>
    %c0_45 = arith.constant 0 : index
    %c0_46 = arith.constant 0 : index
    %210 = vector.load %arg4[%c0_45, %c0_46] : memref<64x84xf32, #tpu.memory_space<vmem>>, vector<64x84xf32>
    %cst_47 = arith.constant dense<0.000000e+00> : vector<64x2xf32>
    %211 = tpu.matmul %210, %209, %cst_47 {dimension_numbers = #tpu.dot_dimension_numbers<[1], [0], [0], [1], [0, 0, 1, 1], [], []>} : vector<64x84xf32>, vector<84x2xf32>, vector<64x2xf32> -> vector<64x2xf32>
    %c0_48 = arith.constant 0 : index
    %c0_49 = arith.constant 0 : index
    %212 = vector.load %arg5[%c0_48, %c0_49] : memref<64x1xf32, #tpu.memory_space<vmem>>, vector<64x1xf32>
    %213 = vector.broadcast %212 : vector<64x1xf32> to vector<64x2xf32>
    %214 = arith.addf %211, %213 : vector<64x2xf32>
    %cst_50 = arith.constant 0.000000e+00 : f32
    %215 = vector.broadcast %cst_50 : f32 to vector<64x2xf32>
    %216 = arith.maximumf %214, %215 : vector<64x2xf32>
    %c0_51 = arith.constant 0 : index
    %c0_52 = arith.constant 0 : index
    %c0_53 = arith.constant 0 : index
    %217 = vector.load %arg6[%c0_51, %c0_52, %c0_53] : memref<1x64x2xf32, #tpu.memory_space<vmem>>, vector<1x64x2xf32>
    %218 = vector.shape_cast %217 : vector<1x64x2xf32> to vector<64x2xf32>
    %219 = vector.shape_cast %216 : vector<64x2xf32> to vector<1x64x2xf32>
    tpu.vector_store %arg6[%c0_51, %c0_52, %c0_53], %219 {strides = array<i32>} : memref<1x64x2xf32, #tpu.memory_space<vmem>>, vector<1x64x2xf32>,
    return
  }
  func.func @transform_0(%arg0: i32) -> (i32, i32, i32) {
    %c0_i32 = arith.constant 0 : i32
    %c0_i32_0 = arith.constant 0 : i32
    %c0_i32_1 = arith.constant 0 : i32
    return %arg0, %c0_i32, %c0_i32_0 : i32, i32, i32
  }
  func.func @transform_1(%arg0: i32) -> (i32, i32) {
    %c0_i32 = arith.constant 0 : i32
    %c0_i32_0 = arith.constant 0 : i32
    %c0_i32_1 = arith.constant 0 : i32
    return %c0_i32, %c0_i32_0 : i32, i32
  }
  func.func @transform_2(%arg0: i32) -> (i32, i32) {
    %c0_i32 = arith.constant 0 : i32
    %c0_i32_0 = arith.constant 0 : i32
    %c0_i32_1 = arith.constant 0 : i32
    return %c0_i32, %c0_i32_0 : i32, i32
  }
  func.func @transform_3(%arg0: i32) -> (i32, i32) {
    %c0_i32 = arith.constant 0 : i32
    %c0_i32_0 = arith.constant 0 : i32
    %c0_i32_1 = arith.constant 0 : i32
    return %c0_i32, %c0_i32_0 : i32, i32
  }
  func.func @transform_4(%arg0: i32) -> (i32, i32) {
    %c0_i32 = arith.constant 0 : i32
    %c0_i32_0 = arith.constant 0 : i32
    %c0_i32_1 = arith.constant 0 : i32
    return %c0_i32, %c0_i32_0 : i32, i32
  }
  func.func @transform_5(%arg0: i32) -> (i32, i32, i32) {
    %c0_i32 = arith.constant 0 : i32
    %c0_i32_0 = arith.constant 0 : i32
    %c0_i32_1 = arith.constant 0 : i32
    return %arg0, %c0_i32, %c0_i32_0 : i32, i32, i32
  }
}

</mosaic_0001>

<bundles_post_ra>
// kernel: sipnet_forward.2
= control target key start
LH: loop header
LB: loop body
LE: loop exit
PB: predicated region body
PF: predicated region fallthrough
CT: control target
= control target key end

     0   :  { %vm17_vm0 = vcmask 1043456   ;;  %vm113_vm1 = vcmask 31744   ;;  %vm115_vm2 = vcmask 35840   ;;  %s145_s0 = inlined_call_operand.vmem [shape: bf16[2,4,256], index: 0, kind: input, shape index: {}]   ;;  %s146_s1 = inlined_call_operand.vmem [shape: f32[1,4,5], index: 1, kind: output, shape index: {}]  }
   0x1   :  { %v9_v0 = vld [vmem:[%s145_s0] sm:$0xf]  ;;  %v121_v2 = vld [vmem:[%s145_s0 + $0x4] sm:$0xf] }
   0x2   :  { %v10_v1 = vunpack.c.l.bf16 %v9_v0  ;;  %v100_v14 = vunpack.c.l.bf16 %v121_v2 }
   0x4   :  { %12 = vst [vmem:[#allocation1] ss:$2 sm:$0xff] %v10_v1 }
   0xb   :  { %v13_v3 = vld.sshfl [vmem:[#allocation1] sm:$0xff pattern:$0x75316420]  ;;  %v14_v4 = vld.sshfl [vmem:[#allocation1 + $0x8] sm:$0xff pattern:$0x75316420] }
   0xc   :  { %27 = vst [vmem:[#allocation1] ss:$4 sm:$0xff] %v121_v2  ;;  %v18_v7 = vsel %vm17_vm0, %v13_v3, 0.0  ;;  %v19_v8 = vsel %vm17_vm0, %v14_v4, 0.0 }
   0xd   :  { %v20_v9 = vadd.f32 %v19_v8, %v18_v7 }
   0xf   :  { %21 = vadd.xlane.f32.xlu0 %v20_v9 }
  0x13   :  { %v28_v5 = vld.sshfl [vmem:[#allocation1] sm:$0xff pattern:$0x73625140]  ;;  %v29_v6 = vld.sshfl [vmem:[#allocation1 + $0x8] sm:$0xff pattern:$0x73625140] }
  0x14   :  { %32 = vst [vmem:[#allocation1] ss:$4 sm:$0xff] %v121_v2 }
  0x1b   :  { %v33_v10 = vld.sshfl [vmem:[#allocation1] sm:$0xff pattern:$0x73625140]  ;;  %v34_v11 = vld.sshfl [vmem:[#allocation1 + $0x8] sm:$0xff pattern:$0x73625140] }
  0x1c   :  { %44 = vmatpush.bf16.xpose.msra.mxu0 %v33_v10  ;;  %57 = vmatpush.bf16.xpose.msra.mxu1 %v34_v11  ;;  %64 = vst [vmem:[#allocation1] ss:$4 sm:$0xff] %v9_v0 }
  0x23   :  { %v65_v12 = vld.sshfl [vmem:[#allocation1] sm:$0xff pattern:$0x73625140]  ;;  %v66_v13 = vld.sshfl [vmem:[#allocation1 + $0x8] sm:$0xff pattern:$0x73625140]  ;;  %45 = vmatmul.bf16.vlgmr.msra.gmra.mxu0 %v28_v5  ;;  %58 = vmatmul.bf16.vlgmr.msra.gmra.mxu1 %v29_v6 }
  0x24   :  { %69 = vst [vmem:[#allocation1] ss:$4 sm:$0xff] %v9_v0 }
  0x2b   :  { %v70_v15 = vld.sshfl [vmem:[#allocation1] sm:$0xff pattern:$0x73625140]  ;;  %v71_v16 = vld.sshfl [vmem:[#allocation1 + $0x8] sm:$0xff pattern:$0x73625140] }
  0x2c   :  { %81 = vmatpush.bf16.xpose.msra.mxu2 %v70_v15  ;;  %94 = vmatpush.bf16.xpose.msra.mxu3 %v71_v16  ;;  %102 = vst [vmem:[#allocation1] ss:$2 sm:$0xff] %v100_v14 }
  0x33   :  { %82 = vmatmul.bf16.vlgmr.msra.gmra.mxu2 %v65_v12  ;;  %95 = vmatmul.bf16.vlgmr.msra.gmra.mxu3 %v66_v13  ;;  %v103_v17 = vld.sshfl [vmem:[#allocation1] sm:$0xff pattern:$0x75316420]  ;;  %v104_v18 = vld.sshfl [vmem:[#allocation1 + $0x8] sm:$0xff pattern:$0x75316420] }
  0x34   :  { %v107_v19 = vsel %vm17_vm0, %v103_v17, 0.0  ;;  %v108_v20 = vsel %vm17_vm0, %v104_v18, 0.0 }
  0x35   :  { %v109_v21 = vadd.f32 %v108_v20, %v107_v19 }
  0x37   :  { %110 = vadd.xlane.f32.xlu0 %v109_v21 }
  0x82   :  { %v22_v26 = vpop.xlane.xlu0 %21 }
  0xa0   :  { %v46_v22 = vpop.f32.mrf.mxu0  ;;  %v59_v23 = vpop.f32.mrf.mxu1 }
  0xa1   :  { %v60_v27 = vadd.f32 %v59_v23, %v46_v22 }
  0xa8   :  { %v48_v24 = vpop.f32.mrf.mxu0  ;;  %v61_v25 = vpop.f32.mrf.mxu1 }
  0xaa   :  { %v111_v28 = vpop.xlane.xlu0 %110 }
  0xab   :  { %v112_v32 = vadd.f32 %v111_v28, %v22_v26 }
  0xb6   :  { %v83_v29 = vpop.f32.mrf.mxu2  ;;  %v96_v30 = vpop.f32.mrf.mxu3 }
  0xb7   :  { %v84_v31 = vadd.f32 %v83_v29, %v60_v27 }
  0xb9   :  { %v97_v33 = vadd.f32 %v96_v30, %v84_v31 }
  0xbb   :  { %v114_v34 = vsel %vm113_vm1, %v97_v33, %v112_v32 }
  0xbc   :  { %116 = vst.msk [vmem:[%s146_s1] sm:$0xf] %vm115_vm2, %v114_v34 }
  0xbe   :  { %v85_v35 = vpop.f32.mrf.mxu2  ;;  %v98_v36 = vpop.f32.mrf.mxu3 }

// kernel: sipnet_forward.3
= control target key start
LH: loop header
LB: loop body
LE: loop exit
PB: predicated region body
PF: predicated region fallthrough
CT: control target
= control target key end

     0   :  { %v686_v1 = vmov 1   ;;  %v687_v2 = vmov 0   ;;  %vm32_vm0 = vcmask 1041408   ;;  %vm28_vm1 = vcmask 31744   ;;  %s691_s26 = smov 1   ;;  %s954_s0 = inlined_call_operand.vmem [shape: bf16[2,4,256], index: 0, kind: input, shape index: {}]   ;;  %s955_s2 = inlined_call_operand.vmem [shape: f32[4,2], index: 2, kind: input, shape index: {}]   ;;  %s956_s1 = inlined_call_operand.vmem [shape: bf16[4,4], index: 1, kind: input, shape index: {}]   ;;  %s957_s4 = inlined_call_operand.vmem [shape: f32[64,1], index: 4, kind: input, shape index: {}]   ;;  %s958_s3 = inlined_call_operand.vmem [shape: f32[64,84], index: 3, kind: input, shape index: {}]   ;;  %s959_s5 = inlined_call_operand.vmem [shape: f32[1,64,2], index: 5, kind: output, shape index: {}]  }
   0x1   :  { %v23_v0 = vld [vmem:[%s954_s0] sm:$0xf]  ;;  %642 = vset.pattern.permute.xlu0 %v686_v1  ;;  %684 = vset.pattern.permute.xlu1 %v687_v2  ;;  %v591_v4 = vld [vmem:[%s954_s0 + $0x4] sm:$0xf]  ;;  %s688_s0 = smov 80   ;;  %vm115_vm2 = vcmask 618048  }
   0x2   :  { %25 = vst [vmem:[#allocation1] ss:$4 sm:$0xff] %v23_v0  ;;  %v22_v3 = vld [vmem:[%s955_s2] sm:$0xf]  ;;  %685 = vset.pattern.permute.xlu2 %v687_v2  ;;  %s690_s2 = smov 112   ;;  %vm119_vm3 = vcmask 650848  }
   0x3   :  { %71 = vperm.xlu0 %642, %v22_v3   ;;  %v21_v9 = vld [vmem:[%s956_s1] sm:$0x3]  ;;  %s689_s1 = smov 96   ;;  %vm107_vm4 = vcmask 552448   ;;  %vm111_vm5 = vcmask 585248   ;;  %vm99_vm6 = vcmask 93248  }
   0x4   :  { %vm103_vm7 = vcmask 126048   ;;  %vm91_vm8 = vcmask 27648   ;;  %vm95_vm9 = vcmask 60448   ;;  %vm199_vm10 = vcmask 1043456  }
   0x5   :  { %vm431_vm11 = vcmask 7168   ;;  %vm499_vm12 = vcmask 687104   ;;  %vm576_vm13 = vcmask 15360  }
   0x9   :  { %v26_v5 = vld.sshfl [vmem:[#allocation1] sm:$0xff pattern:$0x73625140]  ;;  %v27_v6 = vld.sshfl [vmem:[#allocation1 + $0x8] sm:$0xff pattern:$0x73625140] }
   0xa   :  { %v33_v7 = vsel %vm32_vm0, %v26_v5, 0  ;;  %v35_v8 = vsel %vm32_vm0, %v27_v6, 0  ;;  %219 = vst [vmem:[#allocation1] ss:$4 sm:$0xff] %v591_v4 }
   0xb   :  { %44 = vmatpush.bf16.msra.mxu0 %v33_v7  ;;  %57 = vmatpush.bf16.msra.mxu1 %v35_v8 }
   0xc   :  { %643 = vset.pattern.permute.xlu0 %v687_v2 }
   0xd   :  { %65 = vperm.xlu0 %643, %v22_v3  }
   0xe   :  { %589 = vmatmul.msk.bf16.vlgmr.msra.gmra.mxu0 %vm28_vm1, %v21_v9  ;;  %590 = vmatmul.msk.bf16.vlgmr.msra.gmra.mxu1 %vm28_vm1, %v21_v9 }
  0x11   :  { %v220_v10 = vld.sshfl [vmem:[#allocation1] sm:$0xff pattern:$0x73625140]  ;;  %v221_v11 = vld.sshfl [vmem:[#allocation1 + $0x8] sm:$0xff pattern:$0x73625140] }
  0x12   :  { %v222_v12 = vsel %vm32_vm0, %v220_v10, 0  ;;  %v224_v13 = vsel %vm32_vm0, %v221_v11, 0 }
  0x13   :  { %233 = vmatpush.bf16.msra.mxu2 %v222_v12  ;;  %246 = vmatpush.bf16.msra.mxu3 %v224_v13 }
  0x16   :  { %592 = vmatmul.msk.bf16.vlgmr.msra.gmra.mxu2 %vm28_vm1, %v21_v9  ;;  %593 = vmatmul.msk.bf16.vlgmr.msra.gmra.mxu3 %vm28_vm1, %v21_v9 }
  0x75   :  { %v72_v14 = vpop.permute.xlu0 %71 }
  0x7f   :  { %v66_v15 = vpop.permute.xlu0 %65 }
  0x8b   :  { %v46_v16 = vpop.f32.mrf.mxu0  ;;  %v59_v17 = vpop.f32.mrf.mxu1 }
  0x8c   :  { %v69_v18 = vmul.f32 %v66_v15, %v59_v17  ;;  %v68_v27 = vmul.f32 %v66_v15, %v46_v16 }
  0x8e   :  { %v75_v19 = vadd.f32 %v72_v14, %v69_v18  ;;  %v74_v31 = vadd.f32 %v72_v14, %v68_v27 }
  0x90   :  { %v77_v20 = vmax.f32 %v75_v19, 0.0  ;;  %v76_v35 = vmax.f32 %v74_v31, 0.0 }
  0x92   :  { %132 = vrot.lane.b32.xlu2 %v77_v20, %s688_s0  ;;  %128 = vrot.lane.b32.xlu1 %v77_v20, %s689_s1 }
  0x93   :  { %124 = vrot.lane.b32.xlu0 %v77_v20, %s690_s2  ;;  %v61_v21 = vpop.f32.mrf.mxu1  ;;  %v48_v22 = vpop.f32.mrf.mxu0 }
  0x99   :  { %v235_v23 = vpop.f32.mrf.mxu2  ;;  %v248_v24 = vpop.f32.mrf.mxu3 }
  0x9a   :  { %v252_v25 = vmul.f32 %v235_v23, %v66_v15  ;;  %v253_v26 = vmul.f32 %v248_v24, %v66_v15 }
  0x9c   :  { %v255_v28 = vadd.f32 %v253_v26, %v72_v14  ;;  %v738_v29 = vadd.f32 %v252_v25, %v72_v14 }
  0x9e   :  { %v257_v30 = vmax.f32 %v255_v28, 0.0  ;;  %v256_v34 = vmax.f32 %v738_v29, 0.0 }
  0xa0   :  { %304 = vrot.lane.b32.xlu2 %v257_v30, %s688_s0  ;;  %296 = vrot.lane.b32.xlu1 %v257_v30, %s690_s2  ;;  %v644_v36 = vpack.i.bf16 %v76_v35, %v256_v34 }
  0xa1   :  { %v250_v32 = vpop.f32.mrf.mxu3  ;;  %v237_v33 = vpop.f32.mrf.mxu2 }
  0xa8   :  { %300 = vrot.lane.b32.xlu1 %v257_v30, %s689_s1  ;;  %645 = vrot.lane.b32.xlu2 %v644_v36, %s690_s2 }
  0xb0   :  { %650 = vrot.lane.b32.xlu1 %v644_v36, %s689_s1  ;;  %655 = vrot.lane.b32.xlu2 %v644_v36, %s688_s0 }
  0xec   :  { %v133_v38 = vpop.permute.xlu2 %132 }
  0xfa   :  { %v305_v46 = vpop.permute.xlu2 %304 }
 0x102   :  { %v646_v50 = vpop.permute.xlu2 %645 }
 0x103   :  { %v648_v56 = vunpack.i.h.bf16 %v646_v50  ;;  %v647_v3 = vunpack.i.l.bf16 %v646_v50 }
 0x104   :  { %v129_v40 = vpop.permute.xlu1 %128 }
 0x105   :  { %v125_v37 = vpop.permute.xlu0 %124  ;;  %v82_v60 = vmax.f32 %v76_v35, %v648_v56  ;;  %v262_v12 = vmax.f32 %v256_v34, %v647_v3 }
 0x106   :  { %v127_v39 = vmax.f32 %v77_v20, %v125_v37 }
 0x108   :  { %v131_v41 = vmax.f32 %v127_v39, %v129_v40 }
 0x10a   :  { %v135_v42 = vmax.f32 %v131_v41, %v133_v38  ;;  %v656_v58 = vpop.permute.xlu2 %655 }
 0x10b   :  { %v658_v63 = vunpack.i.h.bf16 %v656_v58  ;;  %v657_v15 = vunpack.i.l.bf16 %v656_v58 }
 0x10c   :  { %v154_v43 = vsel %vm115_vm2, %v135_v42, -inf  ;;  %v157_v44 = vsel %vm119_vm3, %v135_v42, -inf  ;;  %v148_v45 = vsel %vm107_vm4, %v135_v42, -inf  ;;  %v151_v48 = vsel %vm111_vm5, %v135_v42, -inf }
 0x10d   :  { %155 = vmax.xlane.f32.xlu0 %v154_v43  ;;  %158 = vmax.xlane.f32.xlu1 %v157_v44  ;;  %v142_v49 = vsel %vm99_vm6, %v135_v42, -inf  ;;  %v145_v54 = vsel %vm103_vm7, %v135_v42, -inf  ;;  %v136_v62 = vsel %vm91_vm8, %v135_v42, -inf  ;;  %v139_v6 = vsel %vm95_vm9, %v135_v42, -inf }
 0x10e   :  { %149 = vmax.xlane.f32.xlu2 %v148_v45 }
 0x112   :  { %v297_v47 = vpop.permute.xlu1 %296 }
 0x113   :  { %v299_v51 = vmax.f32 %v257_v30, %v297_v47 }
 0x115   :  { %152 = vmax.xlane.f32.xlu0 %v151_v48 }
 0x116   :  { %143 = vmax.xlane.f32.xlu2 %v142_v49 }
 0x11a   :  { %v301_v52 = vpop.permute.xlu1 %300 }
 0x11b   :  { %v303_v53 = vmax.f32 %v299_v51, %v301_v52 }
 0x11d   :  { %v307_v55 = vmax.f32 %v303_v53, %v305_v46  ;;  %146 = vmax.xlane.f32.xlu0 %v145_v54 }
 0x11f   :  { %v320_v57 = vsel %vm107_vm4, %v307_v55, -inf  ;;  %v323_v2 = vsel %vm111_vm5, %v307_v55, -inf  ;;  %v308_v14 = vsel %vm91_vm8, %v307_v55, -inf  ;;  %v329_v16 = vsel %vm119_vm3, %v307_v55, -inf }
 0x120   :  { %321 = vmax.xlane.f32.xlu2 %v320_v57  ;;  %v317_v20 = vsel %vm103_vm7, %v307_v55, -inf  ;;  %v326_v24 = vsel %vm115_vm2, %v307_v55, -inf  ;;  %v314_v27 = vsel %vm99_vm6, %v307_v55, -inf  ;;  %v311_v29 = vsel %vm95_vm9, %v307_v55, -inf }
 0x122   :  { %v651_v59 = vpop.permute.xlu1 %650 }
 0x123   :  { %v653_v61 = vunpack.i.h.bf16 %v651_v59  ;;  %v652_v5 = vunpack.i.l.bf16 %v651_v59 }
 0x125   :  { %v86_v0 = vmax.f32 %v82_v60, %v653_v61  ;;  %137 = vmax.xlane.f32.xlu0 %v136_v62  ;;  %v266_v13 = vmax.f32 %v262_v12, %v652_v5 }
 0x127   :  { %v90_v1 = vmax.f32 %v86_v0, %v658_v63  ;;  %v270_v17 = vmax.f32 %v266_v13, %v657_v15 }
 0x128   :  { %324 = vmax.xlane.f32.xlu2 %v323_v2 }
 0x129   :  { %v116_v4 = vsel %vm115_vm2, %v90_v1, -inf  ;;  %v92_v7 = vsel %vm91_vm8, %v90_v1, -inf  ;;  %v96_v8 = vsel %vm95_vm9, %v90_v1, -inf  ;;  %v100_v9 = vsel %vm99_vm6, %v90_v1, -inf }
 0x12a   :  { %117 = vmax.xlane.f32.xlu1 %v116_v4  ;;  %v758_v10 = vsel %vm103_vm7, %v90_v1, -inf  ;;  %v761_v11 = vsel %vm111_vm5, %v90_v1, -inf  ;;  %v120_v18 = vsel %vm119_vm3, %v90_v1, -inf  ;;  %v292_v19 = vsel %vm119_vm3, %v270_v17, -inf }
 0x12b   :  { %v108_v21 = vsel %vm107_vm4, %v90_v1, -inf  ;;  %v271_v22 = vsel %vm91_vm8, %v270_v17, -inf  ;;  %v289_v23 = vsel %vm115_vm2, %v270_v17, -inf  ;;  %v280_v25 = vsel %vm103_vm7, %v270_v17, -inf }
 0x12c   :  { %v286_v26 = vsel %vm111_vm5, %v270_v17, -inf  ;;  %v277_v28 = vsel %vm99_vm6, %v270_v17, -inf  ;;  %v283_v30 = vsel %vm107_vm4, %v270_v17, -inf  ;;  %v274_v31 = vsel %vm95_vm9, %v270_v17, -inf }
 0x12d   :  { %140 = vmax.xlane.f32.xlu0 %v139_v6 }
 0x130   :  { %309 = vmax.xlane.f32.xlu2 %v308_v14 }
 0x132   :  { %330 = vmax.xlane.f32.xlu1 %v329_v16 }
 0x135   :  { %121 = vmax.xlane.f32.xlu0 %v120_v18 }
 0x138   :  { %293 = vmax.xlane.f32.xlu2 %v292_v19 }
 0x13a   :  { %318 = vmax.xlane.f32.xlu1 %v317_v20 }
 0x13d   :  { %109 = vmax.xlane.f32.xlu0 %v108_v21 }
 0x140   :  { %272 = vmax.xlane.f32.xlu2 %v271_v22 }
 0x142   :  { %290 = vmax.xlane.f32.xlu1 %v289_v23 }
 0x145   :  { %327 = vmax.xlane.f32.xlu0 %v326_v24 }
 0x148   :  { %281 = vmax.xlane.f32.xlu2 %v280_v25 }
 0x14a   :  { %287 = vmax.xlane.f32.xlu1 %v286_v26 }
 0x14d   :  { %315 = vmax.xlane.f32.xlu0 %v314_v27 }
 0x152   :  { %278 = vmax.xlane.f32.xlu1 %v277_v28 }
 0x155   :  { %312 = vmax.xlane.f32.xlu0 %v311_v29  ;;  %v451_v29 = vld [vmem:[%s957_s4] sm:$0xff] }
 0x15d   :  { %284 = vmax.xlane.f32.xlu0 %v283_v30 }
 0x165   :  { %275 = vmax.xlane.f32.xlu0 %v274_v31 }
 0x16d   :  { %93 = vmax.xlane.f32.xlu0 %v92_v7 }
 0x175   :  { %97 = vmax.xlane.f32.xlu0 %v96_v8 }
 0x17d   :  { %101 = vmax.xlane.f32.xlu0 %v100_v9 }
 0x180   :  { %v156_v32 = vpop.xlane.xlu0 %155  ;;  %v784_v39 = vpop.xlane.xlu1 %158 }
 0x181   :  { %v150_v33 = vpop.xlane.xlu2 %149  ;;  %v212_v34 = vrot.slane %v156_v32, 4  ;;  %v170_v42 = vmax.f32 %v156_v32, %v784_v39 }
 0x182   :  { %v209_v40 = vrot.slane %v150_v33, 4 }
 0x188   :  { %v153_v35 = vpop.xlane.xlu0 %152 }
 0x189   :  { %v167_v36 = vmax.f32 %v150_v33, %v153_v35  ;;  %v782_v37 = vsel %vm199_vm10, %v153_v35, %v212_v34  ;;  %v144_v38 = vpop.xlane.xlu2 %143  ;;  %v453_v35 = vld [vmem:[%s957_s4 + $0x10] sm:$0xff] }
 0x18a   :  { %v197_v51 = vrot.slane %v144_v38, 4 }
 0x190   :  { %v147_v41 = vpop.xlane.xlu0 %146 }
 0x191   :  { %v169_v43 = vmax.f32 %v144_v38, %v147_v41  ;;  %v788_v44 = vsel %vm199_vm10, %v147_v41, %v209_v40 }
 0x193   :  { %v790_v45 = vmax.f32 %v169_v43, %v170_v42  ;;  %v322_v46 = vpop.xlane.xlu2 %321  ;;  %v456_v42 = vld [vmem:[%s957_s4 + $0x28] sm:$0xff] }
 0x194   :  { %v380_v2 = vrot.slane %v322_v46, 4 }
 0x198   :  { %v138_v47 = vpop.xlane.xlu0 %137 }
 0x199   :  { %v194_v58 = vrot.slane %v138_v47, 4 }
 0x19b   :  { %v325_v48 = vpop.xlane.xlu2 %324 }
 0x19c   :  { %v339_v49 = vmax.f32 %v322_v46, %v325_v48 }
 0x19d   :  { %v792_v50 = vpop.xlane.xlu1 %117 }
 0x1a0   :  { %v141_v52 = vpop.xlane.xlu0 %140 }
 0x1a1   :  { %v166_v53 = vmax.f32 %v138_v47, %v141_v52  ;;  %v795_v54 = vsel %vm199_vm10, %v141_v52, %v197_v51 }
 0x1a3   :  { %v797_v55 = vmax.f32 %v166_v53, %v167_v36  ;;  %v310_v63 = vpop.xlane.xlu2 %309 }
 0x1a4   :  { %v366_v12 = vrot.slane %v310_v63, 4 }
 0x1a5   :  { %v173_v56 = vmax.f32 %v797_v55, %v790_v45  ;;  %v331_v57 = vpop.xlane.xlu1 %330 }
 0x1a6   :  { %418 = vrot.lane.b32.xlu1 %v331_v57, %s691_s26 }
 0x1a8   :  { %v802_v59 = vpop.xlane.xlu0 %121 }
 0x1a9   :  { %v164_v60 = vmax.f32 %v792_v50, %v802_v59  ;;  %v808_v61 = vsel %vm199_vm10, %v802_v59, %v194_v58  ;;  %v455_v59 = vld [vmem:[%s957_s4 + $0x20] sm:$0xff] }
 0x1ab   :  { %v294_v7 = vpop.xlane.xlu2 %293 }
 0x1ac   :  { %v377_v16 = vsel %vm199_vm10, %v294_v7, %v366_v12 }
 0x1ad   :  { %v319_v0 = vpop.xlane.xlu1 %318 }
 0x1ae   :  { %v385_v4 = vsel %vm199_vm10, %v319_v0, %v380_v2 }
 0x1b0   :  { %v810_v62 = vpop.xlane.xlu0 %109 }
 0x1b3   :  { %v273_v14 = vpop.xlane.xlu2 %272 }
 0x1b4   :  { %v354_v36 = vrot.slane %v273_v14, 4 }
 0x1b5   :  { %v291_v9 = vpop.xlane.xlu1 %290 }
 0x1b6   :  { %v363_v23 = vrot.slane %v291_v9, 4 }
 0x1b8   :  { %v328_v1 = vpop.xlane.xlu0 %327 }
 0x1b9   :  { %v383_v3 = vrot.slane %v328_v1, 4  ;;  %v342_v32 = vmax.f32 %v328_v1, %v331_v57 }
 0x1bb   :  { %v386_v5 = vsel %vm199_vm10, %v325_v48, %v383_v3  ;;  %v282_v25 = vpop.xlane.xlu2 %281  ;;  %v336_v48 = vmax.f32 %v291_v9, %v294_v7 }
 0x1bc   :  { %v659_v6 = vpack.i.bf16 %v385_v4, %v386_v5 }
 0x1bd   :  { %v288_v21 = vpop.xlane.xlu1 %287 }
 0x1be   :  { %660 = vrot.lane.b32.xlu2 %v659_v6, %s691_s26  ;;  %v376_v26 = vsel %vm199_vm10, %v288_v21, %v363_v23 }
 0x1c0   :  { %v316_v8 = vpop.xlane.xlu0 %315 }
 0x1c1   :  { %v369_v13 = vrot.slane %v316_v8, 4  ;;  %v341_v30 = vmax.f32 %v316_v8, %v319_v0 }
 0x1c5   :  { %v279_v31 = vpop.xlane.xlu1 %278 }
 0x1c6   :  { %v357_v34 = vrot.slane %v279_v31, 4  ;;  %v335_v46 = vmax.f32 %v279_v31, %v282_v25 }
 0x1c8   :  { %v313_v15 = vpop.xlane.xlu0 %312  ;;  %v337_v51 = vmax.f32 %v335_v46, %v336_v48 }
 0x1c9   :  { %v338_v17 = vmax.f32 %v310_v63, %v313_v15  ;;  %v378_v18 = vsel %vm199_vm10, %v313_v15, %v369_v13 }
 0x1ca   :  { %v664_v19 = vpack.i.bf16 %v377_v16, %v378_v18  ;;  %v179_v18 = vrot.slane %v797_v55, 4 }
 0x1cb   :  { %v340_v20 = vmax.f32 %v338_v17, %v339_v49 }
 0x1cc   :  { %665 = vrot.lane.b32.xlu2 %v664_v19, %s691_s26 }
 0x1cd   :  { %v351_v58 = vrot.slane %v340_v20, 4 }
 0x1cf   :  { %v372_v1 = vsel %vm199_vm10, %v337_v51, %v351_v58  ;;  %v449_v58 = vld [vmem:[%s958_s3 + $0x30] sm:$0xff] }
 0x1d0   :  { %v285_v22 = vpop.xlane.xlu0 %284  ;;  %105 = vmax.xlane.f32.xlu1 %v758_v10  ;;  %v343_v10 = vmax.f32 %v341_v30, %v342_v32 }
 0x1d1   :  { %v360_v24 = vrot.slane %v285_v22, 4  ;;  %v333_v47 = vmax.f32 %v285_v22, %v288_v21  ;;  %v457_v21 = vld [vmem:[%s957_s4 + $0x30] sm:$0xff]  ;;  %v191_v22 = vrot.slane %v792_v50, 4 }
 0x1d2   :  { %v373_v40 = vsel %vm199_vm10, %v343_v10, %v354_v36  ;;  %v345_v53 = vmax.f32 %v340_v20, %v343_v10  ;;  %v454_v20 = vld [vmem:[%s957_s4 + $0x18] sm:$0xff] }
 0x1d3   :  { %v375_v27 = vsel %vm199_vm10, %v282_v25, %v360_v24  ;;  %v458_v24 = vld [vmem:[%s957_s4 + $0x38] sm:$0xff]  ;;  %v188_v25 = vrot.slane %v810_v62, 4 }
 0x1d4   :  { %v669_v28 = vpack.i.bf16 %v375_v27, %v376_v26 }
 0x1d6   :  { %670 = vrot.lane.b32.xlu0 %v669_v28, %s691_s26 }
 0x1d8   :  { %v276_v33 = vpop.xlane.xlu0 %275 }
 0x1d9   :  { %v374_v38 = vsel %vm199_vm10, %v276_v33, %v357_v34  ;;  %v332_v43 = vmax.f32 %v273_v14, %v276_v33 }
 0x1da   :  { %v674_v41 = vpack.i.bf16 %v373_v40, %v374_v38 }
 0x1db   :  { %v334_v49 = vmax.f32 %v332_v43, %v333_v47 }
 0x1dd   :  { %v344_v52 = vmax.f32 %v334_v49, %v337_v51  ;;  %v348_v63 = vrot.slane %v334_v49, 4 }
 0x1de   :  { %461 = vperm.xlu0 %643, %v451_v29  }
 0x1df   :  { %v346_v57 = vmax.f32 %v344_v52, %v345_v53  ;;  %v443_v52 = vld [vmem:[%s958_s3] sm:$0xff]  ;;  %v445_v53 = vld [vmem:[%s958_s3 + $0x10] sm:$0xff] }
 0x1e1   :  { %v371_v0 = vsel %vm199_vm10, %v346_v57, %v348_v63  ;;  %v447_v57 = vld [vmem:[%s958_s3 + $0x20] sm:$0xff]  ;;  %v444_v63 = vld [vmem:[%s958_s3 + $0x8] sm:$0xff] }
 0x1e2   :  { %v679_v2 = vpack.i.bf16 %v371_v0, %v372_v1  ;;  %v446_v0 = vld [vmem:[%s958_s3 + $0x18] sm:$0xff]  ;;  %v448_v1 = vld [vmem:[%s958_s3 + $0x28] sm:$0xff] }
 0x1e6   :  { %471 = vperm.xlu0 %643, %v453_v35  }
 0x1e9   :  { %675 = vrot.lane.b32.xlu1 %v674_v41, %s691_s26 }
 0x1ee   :  { %486 = vperm.xlu0 %643, %v456_v42  }
 0x1f5   :  { %113 = vmax.xlane.f32.xlu2 %v761_v11 }
 0x20d   :  { %680 = vrot.lane.b32.xlu2 %v679_v2, %s691_s26  ;;  %v450_v2 = vld [vmem:[%s958_s3 + $0x38] sm:$0xff] }
 0x215   :  { %481 = vperm.xlu2 %685, %v455_v59  }
 0x218   :  { %v661_v11 = vpop.permute.xlu2 %660  ;;  %v419_v3 = vpop.permute.xlu1 %418 }
 0x219   :  { %v663_v4 = vunpack.i.h.bf16 %v661_v11  ;;  %v662_v5 = vunpack.i.l.bf16 %v661_v11  ;;  %v442_v6 = vsel %vm431_vm11, %v784_v39, %v419_v3 }
 0x21a   :  { %594 = vmatpush.msk.msrb.mxu0 %vm199_vm10, %v442_v6  ;;  %603 = vmatpush.msk.msrb.mxu1 %vm199_vm10, %v442_v6 }
 0x21b   :  { %604 = vmatpush.msk.msrb.mxu2 %vm199_vm10, %v442_v6  ;;  %605 = vmatpush.msk.msrb.mxu3 %vm199_vm10, %v442_v6  ;;  %v441_v7 = vsel %vm431_vm11, %v782_v37, %v662_v5  ;;  %v440_v8 = vsel %vm431_vm11, %v788_v44, %v663_v4  ;;  %v94_v44 = vpop.xlane.xlu0 %93 }
 0x21c   :  { %533 = vmatpush.msrb.mxu0 %v441_v7  ;;  %606 = vmatpush.msrb.mxu1 %v441_v7  ;;  %v182_v50 = vrot.slane %v94_v44, 4 }
 0x21d   :  { %607 = vmatpush.msrb.mxu2 %v441_v7  ;;  %608 = vmatpush.msrb.mxu3 %v441_v7 }
 0x21e   :  { %534 = vmatpush.msrb.mxu0 %v440_v8  ;;  %609 = vmatpush.msrb.mxu1 %v440_v8  ;;  %v202_v43 = vsel %vm199_vm10, %v790_v45, %v182_v50 }
 0x21f   :  { %610 = vmatpush.msrb.mxu2 %v440_v8  ;;  %611 = vmatpush.msrb.mxu3 %v440_v8 }
 0x220   :  { %496 = vperm.xlu2 %685, %v458_v24  }
 0x223   :  { %v98_v14 = vpop.xlane.xlu0 %97 }
 0x224   :  { %v160_v29 = vmax.f32 %v94_v44, %v98_v14 }
 0x226   :  { %v666_v39 = vpop.permute.xlu2 %665 }
 0x227   :  { %v668_v9 = vunpack.i.h.bf16 %v666_v39  ;;  %v667_v12 = vunpack.i.l.bf16 %v666_v39 }
 0x229   :  { %v439_v13 = vsel %vm431_vm11, %v795_v54, %v667_v12  ;;  %v438_v37 = vsel %vm431_vm11, %v808_v61, %v668_v9  ;;  %v452_v61 = vld [vmem:[%s957_s4 + $0x8] sm:$0xff] }
 0x22a   :  { %535 = vmatpush.msrb.mxu0 %v439_v13  ;;  %612 = vmatpush.msrb.mxu1 %v439_v13 }
 0x22b   :  { %613 = vmatpush.msrb.mxu2 %v439_v13  ;;  %614 = vmatpush.msrb.mxu3 %v439_v13  ;;  %v102_v15 = vpop.xlane.xlu0 %101 }
 0x22c   :  { %536 = vmatpush.msrb.mxu0 %v438_v37  ;;  %615 = vmatpush.msrb.mxu1 %v438_v37  ;;  %v185_v30 = vrot.slane %v102_v15, 4 }
 0x22d   :  { %616 = vmatpush.msrb.mxu2 %v438_v37  ;;  %617 = vmatpush.msrb.mxu3 %v438_v37 }
 0x22e   :  { %466 = vperm.xlu1 %684, %v452_v61  }
 0x236   :  { %476 = vperm.xlu1 %684, %v454_v20  }
 0x23e   :  { %491 = vperm.xlu1 %684, %v457_v21  }
 0x243   :  { %v106_v16 = vpop.xlane.xlu1 %105 }
 0x244   :  { %v163_v17 = vmax.f32 %v102_v15, %v106_v16  ;;  %v204_v34 = vsel %vm199_vm10, %v106_v16, %v188_v25 }
 0x246   :  { %v165_v54 = vmax.f32 %v163_v17, %v164_v60 }
 0x248   :  { %v201_v19 = vsel %vm199_vm10, %v165_v54, %v179_v18  ;;  %v671_v60 = vpop.permute.xlu0 %670 }
 0x249   :  { %v673_v26 = vunpack.i.h.bf16 %v671_v60  ;;  %v672_v27 = vunpack.i.l.bf16 %v671_v60 }
 0x24b   :  { %v436_v38 = vsel %vm431_vm11, %v204_v34, %v673_v26 }
 0x250   :  { %v462_v3 = vpop.permute.xlu0 %461 }
 0x258   :  { %v472_v5 = vpop.permute.xlu0 %471 }
 0x25b   :  { %v676_v23 = vpop.permute.xlu1 %675 }
 0x25c   :  { %v677_v33 = vunpack.i.l.bf16 %v676_v23  ;;  %v678_v36 = vunpack.i.h.bf16 %v676_v23 }
 0x25e   :  { %v434_v48 = vsel %vm431_vm11, %v202_v43, %v678_v36 }
 0x260   :  { %v487_v60 = vpop.permute.xlu0 %486 }
 0x268   :  { %v114_v28 = vpop.xlane.xlu2 %113 }
 0x269   :  { %v161_v31 = vmax.f32 %v810_v62, %v114_v28  ;;  %v205_v32 = vsel %vm199_vm10, %v114_v28, %v191_v22  ;;  %v203_v62 = vsel %vm199_vm10, %v98_v14, %v185_v30 }
 0x26a   :  { %v437_v10 = vsel %vm431_vm11, %v205_v32, %v672_v27  ;;  %v435_v41 = vsel %vm431_vm11, %v203_v62, %v677_v33 }
 0x26b   :  { %v162_v35 = vmax.f32 %v160_v29, %v161_v31  ;;  %537 = vmatpush.msrb.mxu0 %v437_v10  ;;  %618 = vmatpush.msrb.mxu1 %v437_v10 }
 0x26c   :  { %619 = vmatpush.msrb.mxu2 %v437_v10  ;;  %620 = vmatpush.msrb.mxu3 %v437_v10 }
 0x26d   :  { %v172_v40 = vmax.f32 %v162_v35, %v165_v54  ;;  %538 = vmatpush.msrb.mxu0 %v436_v38  ;;  %621 = vmatpush.msrb.mxu1 %v436_v38  ;;  %v176_v46 = vrot.slane %v162_v35, 4 }
 0x26e   :  { %622 = vmatpush.msrb.mxu2 %v436_v38  ;;  %623 = vmatpush.msrb.mxu3 %v436_v38 }
 0x26f   :  { %v174_v42 = vmax.f32 %v172_v40, %v173_v56  ;;  %539 = vmatpush.msrb.mxu0 %v435_v41  ;;  %624 = vmatpush.msrb.mxu1 %v435_v41 }
 0x270   :  { %625 = vmatpush.msrb.mxu2 %v435_v41  ;;  %626 = vmatpush.msrb.mxu3 %v435_v41  ;;  %v681_v47 = vpop.permute.xlu2 %680 }
 0x271   :  { %v683_v49 = vunpack.i.h.bf16 %v681_v47  ;;  %v682_v51 = vunpack.i.l.bf16 %v681_v47  ;;  %540 = vmatpush.msrb.mxu0 %v434_v48  ;;  %627 = vmatpush.msrb.mxu1 %v434_v48  ;;  %v200_v55 = vsel %vm199_vm10, %v174_v42, %v176_v46 }
 0x272   :  { %628 = vmatpush.msrb.mxu2 %v434_v48  ;;  %629 = vmatpush.msrb.mxu3 %v434_v48 }
 0x273   :  { %v433_v56 = vsel %vm431_vm11, %v201_v19, %v682_v51  ;;  %v432_v45 = vsel %vm431_vm11, %v200_v55, %v683_v49 }
 0x274   :  { %541 = vmatpush.msrb.mxu0 %v433_v56  ;;  %630 = vmatpush.msrb.mxu1 %v433_v56 }
 0x275   :  { %631 = vmatpush.msrb.mxu2 %v433_v56  ;;  %632 = vmatpush.msrb.mxu3 %v433_v56 }
 0x276   :  { %542 = vmatpush.msrb.mxu0 %v432_v45  ;;  %633 = vmatpush.msrb.mxu1 %v432_v45 }
 0x277   :  { %634 = vmatpush.msrb.mxu2 %v432_v45  ;;  %635 = vmatpush.msrb.mxu3 %v432_v45 }
 0x278   :  { %595 = vmatmul.msk.f32.vlgmr.msrb.gmra.mxu0 %vm499_vm12, %v443_v52  ;;  %597 = vmatmul.msk.f32.vlgmr.msrb.gmra.mxu1 %vm499_vm12, %v445_v53  ;;  %v482_v13 = vpop.permute.xlu2 %481 }
 0x279   :  { %599 = vmatmul.msk.f32.vlgmr.msrb.gmra.mxu2 %vm499_vm12, %v447_v57  ;;  %601 = vmatmul.msk.f32.vlgmr.msrb.gmra.mxu3 %vm499_vm12, %v449_v58 }
 0x280   :  { %596 = vmatmul.msk.f32.gmra.mxu0 %vm499_vm12, %v444_v63  ;;  %598 = vmatmul.msk.f32.gmra.mxu1 %vm499_vm12, %v446_v0  ;;  %v497_v22 = vpop.permute.xlu2 %496 }
 0x281   :  { %600 = vmatmul.msk.f32.gmra.mxu2 %vm499_vm12, %v448_v1  ;;  %602 = vmatmul.msk.f32.gmra.mxu3 %vm499_vm12, %v450_v2 }
 0x2a0   :  { %v467_v11 = vpop.permute.xlu1 %466 }
 0x2a8   :  { %v477_v4 = vpop.permute.xlu1 %476 }
 0x2b0   :  { %v492_v37 = vpop.permute.xlu1 %491 }
 0x2f5   :  { %v544_v6 = vpop.f32.mrf.mxu0  ;;  %v550_v7 = vpop.f32.mrf.mxu1 }
 0x2f6   :  { %v545_v8 = vadd.f32 %v544_v6, %v462_v3  ;;  %v551_v39 = vadd.f32 %v550_v7, %v472_v5 }
 0x2f8   :  { %v568_v9 = vmax.f32 %v545_v8, 0.0  ;;  %v570_v12 = vmax.f32 %v551_v39, 0.0 }
 0x2fa   :  { %577 = vst.msk [vmem:[%s959_s5] sm:$0xff] %vm576_vm13, %v568_v9 }
 0x2fb   :  { %579 = vst.msk [vmem:[%s959_s5 + $0x10] sm:$0xff] %vm576_vm13, %v570_v12 }
 0x2fc   :  { %v556_v44 = vpop.f32.mrf.mxu2  ;;  %v562_v14 = vpop.f32.mrf.mxu3 }
 0x2fd   :  { %v557_v15 = vadd.f32 %v556_v44, %v482_v13  ;;  %v563_v16 = vadd.f32 %v562_v14, %v492_v37  ;;  %v547_v17 = vpop.f32.mrf.mxu0  ;;  %v553_v18 = vpop.f32.mrf.mxu1 }
 0x2fe   :  { %v548_v54 = vadd.f32 %v547_v17, %v467_v11  ;;  %v554_v19 = vadd.f32 %v553_v18, %v477_v4 }
 0x2ff   :  { %v572_v61 = vmax.f32 %v557_v15, 0.0  ;;  %v574_v20 = vmax.f32 %v563_v16, 0.0 }
 0x300   :  { %v569_v21 = vmax.f32 %v548_v54, 0.0  ;;  %v571_v59 = vmax.f32 %v554_v19, 0.0 }
 0x301   :  { %581 = vst.msk [vmem:[%s959_s5 + $0x20] sm:$0xff] %vm576_vm13, %v572_v61 }
 0x302   :  { %583 = vst.msk [vmem:[%s959_s5 + $0x30] sm:$0xff] %vm576_vm13, %v574_v20 }
 0x303   :  { %578 = vst.msk [vmem:[%s959_s5 + $0x8] sm:$0xff] %vm576_vm13, %v569_v21 }
 0x304   :  { %580 = vst.msk [vmem:[%s959_s5 + $0x18] sm:$0xff] %vm576_vm13, %v571_v59  ;;  %v559_v23 = vpop.f32.mrf.mxu2  ;;  %v565_v24 = vpop.f32.mrf.mxu3 }
 0x305   :  { %v560_v25 = vadd.f32 %v559_v23, %v487_v60  ;;  %v566_v26 = vadd.f32 %v565_v24, %v497_v22 }
 0x307   :  { %v573_v27 = vmax.f32 %v560_v25, 0.0  ;;  %v575_v28 = vmax.f32 %v566_v26, 0.0 }
 0x309   :  { %582 = vst.msk [vmem:[%s959_s5 + $0x28] sm:$0xff] %vm576_vm13, %v573_v27 }
 0x30a   :  { %584 = vst.msk [vmem:[%s959_s5 + $0x38] sm:$0xff] %vm576_vm13, %v575_v28 }

</bundles_post_ra>
